<compile_context>
chip_gen: v5e
topology: v5e:2x2
jax: 0.10.0
libtpu: 0.0.40
codegen_flags: <defaults>
</compile_context>

<pallas_src>
import math
import functools

import jax
import jax.numpy as jnp
from jax import lax
from jax.experimental import pallas as pl
from jax.experimental.pallas import tpu as pltpu


def _balanced_l1_kernel(feat_ref, ind_ref, mask_ref, target_ref, out_ref,
                        pred_acc, *, alpha, gamma, beta, hw_chunk):
    h = pl.program_id(1)

    # pred accumulator is resident only across the HW-chunk axis.
    @pl.when(h == 0)
    def _():
        pred_acc[...] = jnp.zeros_like(pred_acc)

    slab = feat_ref[0]                                   # (C, HW_CHUNK)
    idx = ind_ref[0]                                     # (1, K) int32
    k = idx.shape[-1]

    # Exact in-VMEM gather via one-hot matmul: each pred column selects exactly
    # one feat column of this chunk (out-of-chunk / out-of-range indices match
    # nothing and contribute 0).
    row_ids = lax.broadcasted_iota(jnp.int32, (hw_chunk, k), 0) + h * hw_chunk
    onehot = (row_ids == idx).astype(slab.dtype)         # (HW_CHUNK, K)
    pred_acc[...] += jnp.dot(slab, onehot, preferred_element_type=jnp.float32)

    # Finalize once per batch: loss math + single cross-lane reduce + store.
    @pl.when(h == pl.num_programs(1) - 1)
    def _():
        pred = pred_acc[...]                              # (C, K) f32
        maskf = mask_ref[0]                               # (1, K) f32
        tgt = target_ref[0]                               # (C, K) f32
        # mask is {0,1}:  |p*m - t*m| == |p - t| * m  ->  single multiply.
        diff = jnp.abs(pred - tgt) * maskf
        bconst = math.exp(gamma / alpha) - 1.0
        loss = jnp.where(
            diff < beta,
            alpha / bconst * (bconst * diff + 1.0)
            * jnp.log(bconst * diff / beta + 1.0) - alpha * diff,
            gamma * diff + gamma / bconst - alpha * beta,
        )
        out_ref[...] = jnp.sum(loss, keepdims=True).reshape(1, 1, 1)


def _pick_hw_chunk(hw, c, k, itemsize, budget_bytes=10 * 1024 * 1024):
    """Largest HW tile (full HW, or a multiple-of-128 divisor of HW) whose
    double-buffered feat slab + one-hot temporaries fit the VMEM budget."""
    pc = -(-c // 8) * 8
    pk = -(-k // 128) * 128

    def bytes_for(chunk):
        return 2 * pc * chunk * itemsize + 3 * chunk * pk * 4

    if bytes_for(hw) <= budget_bytes or hw % 128 != 0:
        return hw
    best = 128
    for chunk in range(128, hw + 1, 128):
        if hw % chunk == 0 and bytes_for(chunk) <= budget_bytes:
            best = chunk
    return best


def l1_loss_balanced(output, mask, ind, target, *, alpha=0.5, gamma=1.5, beta=1.0):
    """Pallas equivalent of L1Loss_Balanced.forward(output, mask, ind, target)."""
    B, C, H, W = output.shape
    K = ind.shape[1]
    HW = H * W

    # Free reshape (no transpose): pred[b, k, c] == feat[b, c, ind[b, k]].
    feat = output.reshape(B, C, HW)
    ind3 = ind.astype(jnp.int32).reshape(B, 1, K)
    mask3 = mask.astype(jnp.float32).reshape(B, 1, K)
    # Put K on lanes for the in-kernel math (target is tiny: B*K*C elements).
    target_t = jnp.transpose(target.astype(jnp.float32), (0, 2, 1))   # (B, C, K)

    itemsize = jnp.dtype(feat.dtype).itemsize
    hw_chunk = _pick_hw_chunk(HW, C, K, itemsize)
    n_chunks = HW // hw_chunk

    # Explicit VMEM budget: double-buffered slab + one-hot temps + small blocks.
    pc = -(-C // 8) * 8
    pk = -(-K // 128) * 128
    est = (2 * pc * hw_chunk * itemsize          # feat double buffer
           + 3 * hw_chunk * pk * 4               # iota / onehot temporaries
           + 2 * (pc + 2 * 8) * pk * 4           # target / mask / ind buffers
           + pc * pk * 4)                        # pred accumulator scratch
    vmem_limit = int(min(110 * 1024 * 1024,
                         max(4 * 1024 * 1024, est * 3 // 2 + (1 << 20))))

    kernel = functools.partial(_balanced_l1_kernel, alpha=float(alpha),
                               gamma=float(gamma), beta=float(beta),
                               hw_chunk=hw_chunk)

    partials = pl.pallas_call(
        kernel,
        out_shape=jax.ShapeDtypeStruct((B, 1, 1), jnp.float32),
        grid=(B, n_chunks),
        in_specs=[
            pl.BlockSpec((1, C, hw_chunk), lambda b, h: (b, 0, h)),   # feat slab
            pl.BlockSpec((1, 1, K), lambda b, h: (b, 0, 0)),          # ind
            pl.BlockSpec((1, 1, K), lambda b, h: (b, 0, 0)),          # mask
            pl.BlockSpec((1, C, K), lambda b, h: (b, 0, 0)),          # target
        ],
        out_specs=pl.BlockSpec((1, 1, 1), lambda b, h: (b, 0, 0)),
        scratch_shapes=[pltpu.VMEM((C, K), jnp.float32)],             # pred acc
        compiler_params=pltpu.CompilerParams(
            dimension_semantics=("parallel", "arbitrary"),
            vmem_limit_bytes=vmem_limit,
        ),
    )(feat, ind3, mask3, target_t)

    # torch sums the mask AFTER expanding it to (B, K, C) -> factor of C.
    mask_sum = jnp.sum(mask.astype(jnp.float32)) * jnp.float32(C)
    return jnp.sum(partials) / (mask_sum + 0.0001)


def _reference(output, mask, ind, target, alpha=0.5, gamma=1.5, beta=1.0):
    """Pure-JAX reference mirroring the PyTorch module (correctness check)."""
    B, C, H, W = output.shape
    feat = jnp.transpose(output, (0, 2, 3, 1)).reshape(B, H * W, C)
    pred = jnp.take_along_axis(feat, ind[:, :, None].astype(jnp.int32), axis=1)
    m = mask.astype(jnp.float32)[:, :, None] * jnp.ones_like(pred)
    p, t = pred * m, target * m
    diff = jnp.abs(p - t)
    b = math.exp(gamma / alpha) - 1.0
    loss = jnp.where(diff < beta,
                     alpha / b * (b * diff + 1.0) * jnp.log(b * diff / beta + 1.0)
                     - alpha * diff,
                     gamma * diff + gamma / b - alpha * beta)
    return loss.sum() / (m.sum() + 0.0001)


if __name__ == "__main__":
    B, C, H, W, K = 2, 4, 16, 16, 8
    key = jax.random.PRNGKey(0)
    k0, k1, k2, k3 = jax.random.split(key, 4)

    output = jax.random.normal(k0, (B, C, H, W), dtype=jnp.float32)
    target = jax.random.normal(k1, (B, K, C), dtype=jnp.float32)
    ind = jax.random.randint(k2, (B, K), 0, H * W, dtype=jnp.int32)
    mask = (jax.random.uniform(k3, (B, K)) > 0.3).astype(jnp.float32)

    loss = jax.block_until_ready(l1_loss_balanced(output, mask, ind, target))
    ref = jax.block_until_ready(_reference(output, mask, ind, target))

    assert jnp.allclose(loss, ref, rtol=1e-5, atol=1e-6), (loss, ref)
    print("KERNEL_OK")
</pallas_src>

<mosaic_0001>
module attributes {stable_mosaic.version = 11 : i64} {
  func.func @_balanced_l1_kernel(%arg0: i32, %arg1: i32, %arg2: memref<1x4x256xf32, #tpu.memory_space<vmem>>, %arg3: memref<1x1x8xi32, #tpu.memory_space<vmem>>, %arg4: memref<1x1x8xf32, #tpu.memory_space<vmem>>, %arg5: memref<1x4x8xf32, #tpu.memory_space<vmem>>, %arg6: memref<1x1x1xf32, #tpu.memory_space<vmem>>, %arg7: memref<4x8xf32, #tpu.memory_space<vmem>>) attributes {dimension_semantics = [#tpu.dimension_semantics<parallel>, #tpu.dimension_semantics<arbitrary>], iteration_bounds = array<i64: 2, 1>, scalar_prefetch = 0 : i64, scratch_operands = 1 : i64, tpu.core_type = #tpu.core_type<tc>, window_params = [{transform_indices = @transform_0, window_bounds = array<i64: 1, 4, 256>}, {transform_indices = @transform_1, window_bounds = array<i64: 1, 1, 8>}, {transform_indices = @transform_2, window_bounds = array<i64: 1, 1, 8>}, {transform_indices = @transform_3, window_bounds = array<i64: 1, 4, 8>}, {transform_indices = @transform_4, window_bounds = array<i64: 1, 1, 1>}]} {
    %c0_i32 = arith.constant 0 : i32
    %0 = arith.cmpi eq, %arg1, %c0_i32 : i32
    %1 = arith.extui %0 : i1 to i32
    %c0_i32_0 = arith.constant 0 : i32
    %2 = arith.cmpi ne, %1, %c0_i32_0 : i32
    scf.if %2 {
      %cst_12 = arith.constant 0.000000e+00 : f32
      %22 = vector.broadcast %cst_12 : f32 to vector<4x8xf32>
      %c0_13 = arith.constant 0 : index
      %c0_14 = arith.constant 0 : index
      %23 = vector.load %arg7[%c0_13, %c0_14] : memref<4x8xf32, #tpu.memory_space<vmem>>, vector<4x8xf32>
      tpu.vector_store %arg7[%c0_13, %c0_14], %22 {strides = array<i32>} : memref<4x8xf32, #tpu.memory_space<vmem>>, vector<4x8xf32>,
    } else {
    }
    %c0 = arith.constant 0 : index
    %c0_1 = arith.constant 0 : index
    %c0_2 = arith.constant 0 : index
    %3 = vector.load %arg2[%c0, %c0_1, %c0_2] : memref<1x4x256xf32, #tpu.memory_space<vmem>>, vector<1x4x256xf32>
    %4 = vector.shape_cast %3 : vector<1x4x256xf32> to vector<4x256xf32>
    %c0_3 = arith.constant 0 : index
    %c0_4 = arith.constant 0 : index
    %c0_5 = arith.constant 0 : index
    %5 = vector.load %arg3[%c0_3, %c0_4, %c0_5] : memref<1x1x8xi32, #tpu.memory_space<vmem>>, vector<1x1x8xi32>
    %6 = vector.shape_cast %5 : vector<1x1x8xi32> to vector<1x8xi32>
    %7 = tpu.iota {dimensions = array<i32: 0>} : vector<256x8xi32>
    %c256_i32 = arith.constant 256 : i32
    %8 = arith.muli %arg1, %c256_i32 : i32
    %9 = vector.broadcast %8 : i32 to vector<256x8xi32>
    %10 = arith.addi %7, %9 : vector<256x8xi32>
    %11 = vector.broadcast %6 : vector<1x8xi32> to vector<256x8xi32>
    %12 = arith.cmpi eq, %10, %11 : vector<256x8xi32>
    %13 = arith.extui %12 : vector<256x8xi1> to vector<256x8xi32>
    %14 = arith.sitofp %13 : vector<256x8xi32> to vector<256x8xf32>
    %c0_6 = arith.constant 0 : index
    %c0_7 = arith.constant 0 : index
    %15 = vector.load %arg7[%c0_6, %c0_7] : memref<4x8xf32, #tpu.memory_space<vmem>>, vector<4x8xf32>
    %cst = arith.constant dense<0.000000e+00> : vector<4x8xf32>
    %16 = tpu.matmul %4, %14, %cst {dimension_numbers = #tpu.dot_dimension_numbers<[1], [0], [0], [1], [0, 0, 1, 1], [], []>} : vector<4x256xf32>, vector<256x8xf32>, vector<4x8xf32> -> vector<4x8xf32>
    %17 = arith.addf %15, %16 : vector<4x8xf32>
    %c0_8 = arith.constant 0 : index
    %c0_9 = arith.constant 0 : index
    %18 = vector.load %arg7[%c0_8, %c0_9] : memref<4x8xf32, #tpu.memory_space<vmem>>, vector<4x8xf32>
    tpu.vector_store %arg7[%c0_8, %c0_9], %17 {strides = array<i32>} : memref<4x8xf32, #tpu.memory_space<vmem>>, vector<4x8xf32>,
    %c0_i32_10 = arith.constant 0 : i32
    %19 = arith.cmpi eq, %arg1, %c0_i32_10 : i32
    %20 = arith.extui %19 : i1 to i32
    %c0_i32_11 = arith.constant 0 : i32
    %21 = arith.cmpi ne, %20, %c0_i32_11 : i32
    scf.if %21 {
      %c0_12 = arith.constant 0 : index
      %c0_13 = arith.constant 0 : index
      %22 = vector.load %arg7[%c0_12, %c0_13] : memref<4x8xf32, #tpu.memory_space<vmem>>, vector<4x8xf32>
      %c0_14 = arith.constant 0 : index
      %c0_15 = arith.constant 0 : index
      %c0_16 = arith.constant 0 : index
      %23 = vector.load %arg4[%c0_14, %c0_15, %c0_16] : memref<1x1x8xf32, #tpu.memory_space<vmem>>, vector<1x1x8xf32>
      %24 = vector.shape_cast %23 : vector<1x1x8xf32> to vector<1x8xf32>
      %c0_17 = arith.constant 0 : index
      %c0_18 = arith.constant 0 : index
      %c0_19 = arith.constant 0 : index
      %25 = vector.load %arg5[%c0_17, %c0_18, %c0_19] : memref<1x4x8xf32, #tpu.memory_space<vmem>>, vector<1x4x8xf32>
      %26 = vector.shape_cast %25 : vector<1x4x8xf32> to vector<4x8xf32>
      %27 = arith.subf %22, %26 : vector<4x8xf32>
      %28 = math.absf %27 : vector<4x8xf32>
      %29 = vector.broadcast %24 : vector<1x8xf32> to vector<4x8xf32>
      %30 = arith.mulf %28, %29 : vector<4x8xf32>
      %cst_20 = arith.constant 1.000000e+00 : f32
      %31 = vector.broadcast %cst_20 : f32 to vector<4x8xf32>
      %32 = arith.cmpf olt, %30, %31 : vector<4x8xf32>
      %cst_21 = arith.constant 19.085537 : f32
      %33 = vector.broadcast %cst_21 : f32 to vector<4x8xf32>
      %34 = arith.mulf %33, %30 : vector<4x8xf32>
      %cst_22 = arith.constant 1.000000e+00 : f32
      %35 = vector.broadcast %cst_22 : f32 to vector<4x8xf32>
      %36 = arith.addf %34, %35 : vector<4x8xf32>
      %cst_23 = arith.constant 0.0261978488 : f32
      %37 = vector.broadcast %cst_23 : f32 to vector<4x8xf32>
      %38 = arith.mulf %37, %36 : vector<4x8xf32>
      %cst_24 = arith.constant 19.085537 : f32
      %39 = vector.broadcast %cst_24 : f32 to vector<4x8xf32>
      %40 = arith.mulf %39, %30 : vector<4x8xf32>
      %cst_25 = arith.constant 1.000000e+00 : f32
      %41 = vector.broadcast %cst_25 : f32 to vector<4x8xf32>
      %42 = arith.divf %40, %41 : vector<4x8xf32>
      %cst_26 = arith.constant 1.000000e+00 : f32
      %43 = vector.broadcast %cst_26 : f32 to vector<4x8xf32>
      %44 = arith.addf %42, %43 : vector<4x8xf32>
      %45 = math.log %44 : vector<4x8xf32>
      %46 = arith.mulf %38, %45 : vector<4x8xf32>
      %cst_27 = arith.constant 5.000000e-01 : f32
      %47 = vector.broadcast %cst_27 : f32 to vector<4x8xf32>
      %48 = arith.mulf %47, %30 : vector<4x8xf32>
      %49 = arith.subf %46, %48 : vector<4x8xf32>
      %cst_28 = arith.constant 1.500000e+00 : f32
      %50 = vector.broadcast %cst_28 : f32 to vector<4x8xf32>
      %51 = arith.mulf %50, %30 : vector<4x8xf32>
      %cst_29 = arith.constant 0.0785935446 : f32
      %52 = vector.broadcast %cst_29 : f32 to vector<4x8xf32>
      %53 = arith.addf %51, %52 : vector<4x8xf32>
      %cst_30 = arith.constant 5.000000e-01 : f32
      %54 = vector.broadcast %cst_30 : f32 to vector<4x8xf32>
      %55 = arith.subf %53, %54 : vector<4x8xf32>
      %56 = arith.select %32, %49, %55 : vector<4x8xi1>, vector<4x8xf32>
      %57 = vector.shape_cast %56 : vector<4x8xf32> to vector<1x4x8xf32>
      %cst_31 = arith.constant dense<0.000000e+00> : vector<1xf32>
      %58 = vector.multi_reduction <add>, %57, %cst_31 [1, 2] : vector<1x4x8xf32> to vector<1xf32>
      %59 = vector.shape_cast %58 : vector<1xf32> to vector<1x1x1xf32>
      %60 = vector.extract %59[0, 0, 0] : f32 from vector<1x1x1xf32>
      %61 = vector.broadcast %60 : f32 to vector<1x1xf32>
      %62 = vector.shape_cast %61 : vector<1x1xf32> to vector<1x1x1xf32>
      %c0_32 = arith.constant 0 : index
      %c0_33 = arith.constant 0 : index
      %c0_34 = arith.constant 0 : index
      %63 = vector.load %arg6[%c0_32, %c0_33, %c0_34] : memref<1x1x1xf32, #tpu.memory_space<vmem>>, vector<1x1x1xf32>
      tpu.vector_store %arg6[%c0_32, %c0_33, %c0_34], %62 {strides = array<i32>} : memref<1x1x1xf32, #tpu.memory_space<vmem>>, vector<1x1x1xf32>,
    } else {
    }
    return
  }
  func.func @transform_0(%arg0: i32, %arg1: i32) -> (i32, i32, i32) {
    %c0_i32 = arith.constant 0 : i32
    %c0_i32_0 = arith.constant 0 : i32
    return %arg0, %c0_i32, %arg1 : i32, i32, i32
  }
  func.func @transform_1(%arg0: i32, %arg1: i32) -> (i32, i32, i32) {
    %c0_i32 = arith.constant 0 : i32
    %c0_i32_0 = arith.constant 0 : i32
    %c0_i32_1 = arith.constant 0 : i32
    return %arg0, %c0_i32, %c0_i32_0 : i32, i32, i32
  }
  func.func @transform_2(%arg0: i32, %arg1: i32) -> (i32, i32, i32) {
    %c0_i32 = arith.constant 0 : i32
    %c0_i32_0 = arith.constant 0 : i32
    %c0_i32_1 = arith.constant 0 : i32
    return %arg0, %c0_i32, %c0_i32_0 : i32, i32, i32
  }
  func.func @transform_3(%arg0: i32, %arg1: i32) -> (i32, i32, i32) {
    %c0_i32 = arith.constant 0 : i32
    %c0_i32_0 = arith.constant 0 : i32
    %c0_i32_1 = arith.constant 0 : i32
    return %arg0, %c0_i32, %c0_i32_0 : i32, i32, i32
  }
  func.func @transform_4(%arg0: i32, %arg1: i32) -> (i32, i32, i32) {
    %c0_i32 = arith.constant 0 : i32
    %c0_i32_0 = arith.constant 0 : i32
    %c0_i32_1 = arith.constant 0 : i32
    return %arg0, %c0_i32, %c0_i32_0 : i32, i32, i32
  }
}

</mosaic_0001>

<bundles_post_ra>
// kernel: tpu_custom_call.1
= control target key start
LH: loop header
LB: loop body
LE: loop exit
PB: predicated region body
PF: predicated region fallthrough
CT: control target
= control target key end

     0   :  { %9 = vsyncpa [#allocation4], 0  ;;  %s1339_s0 = inlined_call_operand.hbm [shape: f32[2,4,256], index: 0, kind: input, shape index: {}]   ;;  %s1340_s1 = inlined_call_operand.hbm [shape: s32[2,1,8], index: 1, kind: input, shape index: {}]   ;;  %s1341_s2 = inlined_call_operand.hbm [shape: f32[2,1,8], index: 2, kind: input, shape index: {}]   ;;  %s1342_s3 = inlined_call_operand.hbm [shape: f32[2,4,8], index: 3, kind: input, shape index: {}]   ;;  %s1343_s4 = inlined_call_operand.vmem [shape: f32[2,1,1], index: 4, kind: output, shape index: {}]  }
   0x1   :  { %11 = vsyncpa [#allocation4 + $0x1], 0 }
   0x2   :  { %12 = vsyncpa [#allocation6], 0 }
   0x3   :  { %14 = vsyncpa [#allocation6 + $0x1], 0 }
   0x4   :  { %15 = vsyncpa [#allocation9], 0 }
   0x5   :  { %17 = vsyncpa [#allocation9 + $0x1], 0  ;;  %s1090_s15 = smov 0   ;;  %s1092_s16 = smov 0  }
   0x6   :  { %s1094_s17 = smov 0   ;;  %s1096_s18 = smov 0  }
   0x7   :  { %s1098_s19 = smov 0   ;;  %s1100_s20 = smov 0  }
   0x8 LB: > { %s1344_s21 = sadd.s32 4294967295, %s1061_s20   ;;  %s35_s22 = sadd.s32 1, %s1057_s19  ;;  %s1061_s20 = sphi %s1100_s20, %s23_s20   ;;  %s1057_s19 = sphi %s1098_s19, %s1353_s19   ;;  %s1053_s18 = sphi %s1096_s18, %s1352_s18   ;;  %s1049_s17 = sphi %s1094_s17, %s1351_s17   ;;  %s1045_s16 = sphi %s1092_s16, %s1350_s16   ;;  %s1041_s15 = sphi %s1090_s15, %s1349_s15  }
   0x9   : > { %p37_p0 = scmp.ge.s32.totalorder %s35_s22, 2  ;;  %s44_s23 = sadd.s32 1, %s1049_s17 }
   0xa   : > { %p51_p1 = scmp.ne.s32.totalorder %s1049_s17, %s1045_s16  ;;  %p52_p2 = scmp.eq.s32.totalorder %s1061_s20, 0 }
   0xb   : > { %s1355_s22 = smov (%p37_p0, %s35_s22), 0  ;;  %p57_p4 = scmp.ne.s32.totalorder %s1045_s16, %s1041_s15 }
   0xc   : > { %p53_p3 = por %p52_p2, %p51_p1  ;;  %s39_s24 = ssub.s32 %s1057_s19, %s1355_s22 }
   0xd   : > { %p58_p5 = scmp.eq.s32.totalorder %s1344_s21, 0  ;;  %p42_p6 = scmp.eq.s32.totalorder %s39_s24, 0 }
   0xe   : > { %p828_p8 = scmp.lt.s32.totalorder %s1061_s20, 2  ;;  %s1140_s27 = sand.u32 1, %s1049_s17  }
   0xf   : > { %p1131_p7 = por %p58_p5, %p57_p4  ;;  %s207_s29 = sand.u32 1, %s1061_s20  }
  0x10   : > { %s1137_s26 = scalar_select %p42_p6, %s1049_s17, %s44_s23  }
  0x11   : > { %p1142_p9 = pnand %p828_p8, %p53_p3  ;;  %s213_s6 = scalar_lea.hbm %s1340_s1, %s1057_s19 }
  0x12   : > { %s210_s7 = scalar_lea.vmem [#allocation5], %s1140_s27  ;;  %s215_s9 = sshll.u32 %s213_s6, 4  ;;  %s216_s9 = int_to_ptr.hbm [resolvable:$true] %s215_s9 }
  0x13   : > { %s217_s8 = sshll.u32 %s210_s7, 4  ;;  %p734_p10 = scmp.ge.s32.totalorder %s1061_s20, 1  ;;  %s218_s8 = int_to_ptr.vmem [resolvable:$true] %s217_s8 }
  0x14   : > { %s208_s10 = scalar_lea.sflag [#allocation6], %s207_s29  ;;  %p258_p11 = scmp.lt.s32.totalorder %s1061_s20, 3 }
  0x15   : > { %821 = dma.hbm_to_vmem [thread:$0]  (!%p1142_p9), %s216_s9, 16, %s218_s8, %s208_s10  }
  0x16   : > { %p1156_p12 = pnand %p734_p10, %p258_p11  ;;  %s729_s12 = sshll.u32 %s1140_s27, 3 }
  0x17   : > { %s804_s13 = sshll.u32 %s1057_s19, 3  ;;  %s189_s24 = scalar_lea.vmem [#allocation3], %s729_s12 }
  0x18   : > { %s196_s23 = scalar_lea.hbm %s1339_s0, %s804_s13  ;;  %s200_s30 = sshll.u32 %s189_s24, 4  ;;  %s201_s30 = int_to_ptr.vmem [resolvable:$true] %s200_s30 }
  0x19   : > { %s198_s5 = sshll.u32 %s196_s23, 4  ;;  %s186_s29 = scalar_lea.sflag [#allocation4], %s1140_s27  ;;  %s199_s5 = int_to_ptr.hbm [resolvable:$true] %s198_s5 }
  0x1a   : > { %818 = dma.hbm_to_vmem [thread:$0]  (!%p1142_p9), %s199_s5, 128, %s201_s30, %s186_s29  }
  0x1b   : > { %s230_s8 = scalar_lea.hbm %s1341_s2, %s1057_s19  ;;  %s227_s9 = scalar_lea.vmem [#allocation7], %s1140_s27 }
  0x1c   : > { %s234_s21 = sshll.u32 %s227_s9, 4  ;;  %s232_s14 = sshll.u32 %s230_s8, 4  ;;  %s235_s21 = int_to_ptr.vmem [resolvable:$true] %s234_s21  ;;  %s233_s14 = int_to_ptr.hbm [resolvable:$true] %s232_s14 }
  0x1d   : > { %824 = dma.hbm_to_vmem [thread:$0]  (!%p1142_p9), %s233_s14, 16, %s235_s21, %s208_s10  }
  0x1e   : > { %s732_s12 = sshll.u32 %s1140_s27, 2  ;;  %s733_s13 = sshll.u32 %s1057_s19, 2 }
  0x1f   : > { %s249_s24 = scalar_lea.hbm %s1342_s3, %s733_s13  ;;  %s245_s5 = scalar_lea.vmem [#allocation8], %s732_s12 }
  0x20   : > { %s251_s30 = sshll.u32 %s249_s24, 4  ;;  %s253_s29 = sshll.u32 %s245_s5, 4  ;;  %s252_s30 = int_to_ptr.hbm [resolvable:$true] %s251_s30  ;;  %s254_s29 = int_to_ptr.vmem [resolvable:$true] %s253_s29 }
  0x21   : > { %s242_s6 = scalar_lea.sflag [#allocation9], %s1140_s27  ;;  %262 = sbr.rel (%p1156_p12) target bundleno = 427 (0x1ab), region = 36 }
  0x22   : > { %827 = dma.hbm_to_vmem [thread:$0]  (!%p1142_p9), %s252_s30, 64, %s254_s29, %s242_s6  }
  0x23   : > { %s1186_s21 = sand.u32 (!%p1156_p12), 1, %s1045_s16  }
  0x24   : > { %s735_s10 = sshll.u32 (!%p1156_p12), %s1186_s21, 3  ;;  %s265_s7 = scalar_lea.sflag (!%p1156_p12), [#allocation4], %s1186_s21 }
  0x25   : > { %s268_s8 = scalar_lea.vmem (!%p1156_p12), [#allocation3], %s735_s10 }
  0x26   : > { %1028 = dma.done.wait (%p1131_p7), %s265_s7, 128  }
  0x27   : > { %1030 = vsyncadd (%p1131_p7), %s265_s7, 4294967168  ;;  %s1348_s27 = sadd.s32 4294967295, %s1061_s20   ;;  %s277_s9 = scalar_lea.vmem [#allocation5], %s1186_s21 }
  0x28   : > { %s274_s28 = sand.u32 1, %s1348_s27  }
  0x29   : > { %s275_s11 = scalar_lea.sflag [#allocation6], %s274_s28 }
  0x2a   : > { %1032 = dma.done.wait (%p1131_p7), %s275_s11, 32  }
  0x2b   : > { %1034 = vsyncadd (%p1131_p7), %s275_s11, 4294967264  ;;  %s736_s14 = sshll.u32 %s1186_s21, 2  ;;  %s286_s12 = scalar_lea.vmem [#allocation7], %s1186_s21 }
  0x2c   : > { %s293_s13 = scalar_lea.sflag [#allocation9], %s1186_s21  ;;  %s1204_s15 = scalar_lea.vmem [#allocation8], %s736_s14 }
  0x2d   : > { %1036 = dma.done.wait (%p1131_p7), %s293_s13, 64  }
  0x2e   : > { %1038 = vsyncadd (%p1131_p7), %s293_s13, 4294967232  ;;  %v345_v0 = vlaneseq  ;;  %v1216_v6 = vld [vmem:[%s277_s9] ss:$0 sm:$0xff]  ;;  %v343_v11 = vld [vmem:[%s268_s8] sm:$0xff]  ;;  %v1063_v12 = vmov 1.0   ;;  %v1064_v38 = vmov 0.0  }
  0x2f   : > { %511 = vst [vmem:[#allocation1] ss:$2 sm:$0xff] %v343_v11  ;;  %v564_v44 = vld [vmem:[%s1204_s15] sm:$0xf]  ;;  %p334_p13 = scmp.lt.s32.totalorder %s1053_s18, 1 }
  0x30   : > { %v1210_v1 = vshrl.u32 %v345_v0, 7  ;;  %v880_v47 = vld [vmem:[%s286_s12] ss:$0 sm:$0xff] }
  0x31   : > { %s1357_s18 = smov (!%p334_p13, %s1053_s18), 1 }
  0x32   : > { %v361_v2 = vadd.s32 120, %v1210_v1  ;;  %v377_v3 = vadd.s32 248, %v1210_v1  ;;  %v360_v4 = vadd.s32 112, %v1210_v1  ;;  %v376_v5 = vadd.s32 240, %v1210_v1  ;;  %s336_s24 = scalar_lea.vmem %s1343_s4, %s1357_s18 }
  0x33   : > { %v359_v7 = vadd.s32 104, %v1210_v1  ;;  %v375_v8 = vadd.s32 232, %v1210_v1  ;;  %v358_v9 = vadd.s32 96, %v1210_v1  ;;  %v374_v10 = vadd.s32 224, %v1210_v1 }
  0x34   : > { %vm428_vm0 = vcmp.eq.s32.totalorder %v361_v2, %v1216_v6  ;;  %vm444_vm1 = vcmp.eq.s32.totalorder %v377_v3, %v1216_v6  ;;  %vm427_vm2 = vcmp.eq.s32.totalorder %v360_v4, %v1216_v6  ;;  %vm443_vm3 = vcmp.eq.s32.totalorder %v376_v5, %v1216_v6 }
  0x35   : > { %769 = vmatpush.msk.msra.mxu0 %vm428_vm0, %v1063_v12  ;;  %785 = vmatpush.msk.msra.mxu1 %vm444_vm1, %v1063_v12  ;;  %vm426_vm4 = vcmp.eq.s32.totalorder %v359_v7, %v1216_v6  ;;  %vm442_vm5 = vcmp.eq.s32.totalorder %v375_v8, %v1216_v6  ;;  %v357_v13 = vadd.s32 88, %v1210_v1  ;;  %v373_v14 = vadd.s32 216, %v1210_v1 }
  0x36   : > { %vm425_vm6 = vcmp.eq.s32.totalorder %v358_v9, %v1216_v6  ;;  %vm441_vm7 = vcmp.eq.s32.totalorder %v374_v10, %v1216_v6  ;;  %v356_v15 = vadd.s32 80, %v1210_v1  ;;  %v372_v16 = vadd.s32 208, %v1210_v1  ;;  %v512_v36 = vld.sshfl [vmem:[#allocation1] sm:$0xff pattern:$0x75316420] }
  0x37   : > { %770 = vmatpush.msk.msra.mxu0 %vm427_vm2, %v1063_v12  ;;  %786 = vmatpush.msk.msra.mxu1 %vm443_vm3, %v1063_v12  ;;  %vm424_vm8 = vcmp.eq.s32.totalorder %v357_v13, %v1216_v6  ;;  %vm440_vm9 = vcmp.eq.s32.totalorder %v373_v14, %v1216_v6  ;;  %v355_v17 = vadd.s32 72, %v1210_v1  ;;  %v371_v18 = vadd.s32 200, %v1210_v1  ;;  %v513_v37 = vld.sshfl [vmem:[#allocation1 + $0x8] sm:$0xff pattern:$0x75316420] }
  0x38   : > { %vm423_vm10 = vcmp.eq.s32.totalorder %v356_v15, %v1216_v6  ;;  %vm439_vm11 = vcmp.eq.s32.totalorder %v372_v16, %v1216_v6  ;;  %v354_v19 = vadd.s32 64, %v1210_v1  ;;  %v370_v20 = vadd.s32 192, %v1210_v1 }
  0x39   : > { %771 = vmatpush.msk.msra.mxu0 %vm426_vm4, %v1063_v12  ;;  %787 = vmatpush.msk.msra.mxu1 %vm442_vm5, %v1063_v12  ;;  %vm422_vm12 = vcmp.eq.s32.totalorder %v355_v17, %v1216_v6  ;;  %vm438_vm13 = vcmp.eq.s32.totalorder %v371_v18, %v1216_v6  ;;  %v353_v21 = vadd.s32 56, %v1210_v1  ;;  %v369_v22 = vadd.s32 184, %v1210_v1 }
  0x3a   : > { %vm421_vm14 = vcmp.eq.s32.totalorder %v354_v19, %v1216_v6  ;;  %vm437_vm15 = vcmp.eq.s32.totalorder %v370_v20, %v1216_v6  ;;  %v352_v23 = vadd.s32 48, %v1210_v1  ;;  %v368_v24 = vadd.s32 176, %v1210_v1 }
  0x3b   : > { %772 = vmatpush.msk.msra.mxu0 %vm425_vm6, %v1063_v12  ;;  %788 = vmatpush.msk.msra.mxu1 %vm441_vm7, %v1063_v12  ;;  %vm420_vm0 = vcmp.eq.s32.totalorder %v353_v21, %v1216_v6  ;;  %vm436_vm1 = vcmp.eq.s32.totalorder %v369_v22, %v1216_v6  ;;  %v351_v25 = vadd.s32 40, %v1210_v1  ;;  %v367_v26 = vadd.s32 168, %v1210_v1 }
  0x3c   : > { %vm419_vm2 = vcmp.eq.s32.totalorder %v352_v23, %v1216_v6  ;;  %vm435_vm3 = vcmp.eq.s32.totalorder %v368_v24, %v1216_v6  ;;  %v350_v27 = vadd.s32 32, %v1210_v1  ;;  %v366_v28 = vadd.s32 160, %v1210_v1 }
  0x3d   : > { %773 = vmatpush.msk.msra.mxu0 %vm424_vm8, %v1063_v12  ;;  %789 = vmatpush.msk.msra.mxu1 %vm440_vm9, %v1063_v12  ;;  %vm418_vm4 = vcmp.eq.s32.totalorder %v351_v25, %v1216_v6  ;;  %vm434_vm5 = vcmp.eq.s32.totalorder %v367_v26, %v1216_v6  ;;  %v349_v29 = vadd.s32 24, %v1210_v1  ;;  %v365_v30 = vadd.s32 152, %v1210_v1 }
  0x3e   : > { %vm417_vm6 = vcmp.eq.s32.totalorder %v350_v27, %v1216_v6  ;;  %vm433_vm7 = vcmp.eq.s32.totalorder %v366_v28, %v1216_v6  ;;  %v348_v31 = vadd.s32 16, %v1210_v1  ;;  %v364_v32 = vadd.s32 144, %v1210_v1 }
  0x3f   : > { %774 = vmatpush.msk.msra.mxu0 %vm423_vm10, %v1063_v12  ;;  %790 = vmatpush.msk.msra.mxu1 %vm439_vm11, %v1063_v12  ;;  %vm416_vm8 = vcmp.eq.s32.totalorder %v349_v29, %v1216_v6  ;;  %vm432_vm9 = vcmp.eq.s32.totalorder %v365_v30, %v1216_v6  ;;  %v347_v33 = vadd.s32 8, %v1210_v1  ;;  %v363_v34 = vadd.s32 136, %v1210_v1 }
  0x40   : > { %vm415_vm10 = vcmp.eq.s32.totalorder %v348_v31, %v1216_v6  ;;  %vm431_vm11 = vcmp.eq.s32.totalorder %v364_v32, %v1216_v6  ;;  %v362_v35 = vadd.s32 128, %v1210_v1 }
  0x41   : > { %775 = vmatpush.msk.msra.mxu0 %vm422_vm12, %v1063_v12  ;;  %791 = vmatpush.msk.msra.mxu1 %vm438_vm13, %v1063_v12  ;;  %vm414_vm12 = vcmp.eq.s32.totalorder %v347_v33, %v1216_v6  ;;  %vm430_vm13 = vcmp.eq.s32.totalorder %v363_v34, %v1216_v6 }
  0x43   : > { %776 = vmatpush.msk.msra.mxu0 %vm421_vm14, %v1063_v12  ;;  %792 = vmatpush.msk.msra.mxu1 %vm437_vm15, %v1063_v12  ;;  %vm413_vm14 = vcmp.eq.s32.totalorder %v1210_v1, %v1216_v6  ;;  %vm429_vm15 = vcmp.eq.s32.totalorder %v362_v35, %v1216_v6 }
  0x45   : > { %777 = vmatpush.msk.msra.mxu0 %vm420_vm0, %v1063_v12  ;;  %793 = vmatpush.msk.msra.mxu1 %vm436_vm1, %v1063_v12  ;;  %vm341_vm0 = vcmask 60416  }
  0x46   : > { %342 = vst.msk [vmem:[#allocation2] sm:$0xf] %vm341_vm0, %v1064_v38 }
  0x47   : > { %778 = vmatpush.msk.msra.mxu0 %vm419_vm2, %v1063_v12  ;;  %794 = vmatpush.msk.msra.mxu1 %vm435_vm3, %v1063_v12  ;;  %vm595_vm2 = vcmask 0  }
  0x49   : > { %779 = vmatpush.msk.msra.mxu0 %vm418_vm4, %v1063_v12  ;;  %795 = vmatpush.msk.msra.mxu1 %vm434_vm5, %v1063_v12 }
  0x4b   : > { %780 = vmatpush.msk.msra.mxu0 %vm417_vm6, %v1063_v12  ;;  %796 = vmatpush.msk.msra.mxu1 %vm433_vm7, %v1063_v12 }
  0x4d   : > { %781 = vmatpush.msk.msra.mxu0 %vm416_vm8, %v1063_v12  ;;  %797 = vmatpush.msk.msra.mxu1 %vm432_vm9, %v1063_v12  ;;  %v509_v41 = vld [vmem:[#allocation2] sm:$0xf] }
  0x4f   : > { %782 = vmatpush.msk.msra.mxu0 %vm415_vm10, %v1063_v12  ;;  %798 = vmatpush.msk.msra.mxu1 %vm431_vm11, %v1063_v12 }
  0x51   : > { %783 = vmatpush.msk.msra.mxu0 %vm414_vm12, %v1063_v12  ;;  %799 = vmatpush.msk.msra.mxu1 %vm430_vm13, %v1063_v12 }
  0x53   : > { %784 = vmatpush.msk.msra.mxu0 %vm413_vm14, %v1063_v12  ;;  %800 = vmatpush.msk.msra.mxu1 %vm429_vm15, %v1063_v12 }
  0x54   : > { %532 = vmatmul.f32.vlgmr.msra.gmra.mxu0 %v512_v36  ;;  %552 = vmatmul.f32.vlgmr.msra.gmra.mxu1 %v513_v37 }
  0xd1   : > { %v533_v39 = vpop.f32.mrf.mxu0  ;;  %v553_v40 = vpop.f32.mrf.mxu1 }
  0xd2   : > { %v554_v42 = vadd.f32 %v553_v40, %v533_v39 }
  0xd4   : > { %v556_v43 = vadd.f32 %v554_v42, %v509_v41 }
  0xd6   : > { %558 = vst.msk [vmem:[#allocation2] sm:$0xf] %vm341_vm0, %v556_v43 }
  0xdd   : > { %v562_v45 = vld [vmem:[#allocation2] sm:$0xf] }
  0xde   : > { %v565_v46 = vsub.f32 %v562_v45, %v564_v44 }
  0xe0   : > { %v566_v48 = vand.u32 2147483647, %v565_v46 }
  0xe2   : > { %v570_v49 = vmul.f32 %v880_v47, %v566_v48 }
  0xe4   : > { %v572_v50 = vmul.f32 19.085537, %v570_v49  ;;  %v580_v52 = vmul.f32 1.5, %v570_v49  ;;  %v578_v58 = vmul.f32 0.5, %v570_v49  ;;  %vm571_vm1 = vcmp.lt.f32.partialorder %v570_v49, 1.0 }
  0xe6   : > { %v573_v51 = vadd.f32 1.0, %v572_v50  ;;  %v581_v56 = vadd.f32 0.078593545, %v580_v52 }
  0xe8   : > { %881 = vlog2.f32 %v573_v51  ;;  %v574_v54 = vmul.f32 0.026197849, %v573_v51  ;;  %v801_v60 = vadd.f32 -0.5, %v581_v56 }
  0xee   : > { %v882_v53 = vpop.eup %881 }
  0xef   : > { %v576_v55 = vmul.f32 0.6931472, %v882_v53 }
  0xf1   : > { %v577_v57 = vmul.f32 %v576_v55, %v574_v54 }
  0xf3   : > { %v579_v59 = vsub.f32 %v577_v57, %v578_v58 }
  0xf5   : > { %v583_v61 = vsel %vm571_vm1, %v579_v59, %v801_v60 }
  0xf6   : > { %v584_v62 = vsel %vm341_vm0, %v583_v61, 0.0 }
  0xf7   : > { %585 = vadd.xlane.f32.xlu0 %v584_v62 }
 0x16a   : > { %v586_v63 = vpop.xlane.xlu0 %585 }
 0x16b   : > { %v587_v0 = vrot.slane %v586_v63, 4 }
 0x16d   : > { %v588_v1 = vadd.f32 %v587_v0, %v586_v63 }
 0x16f   : > { %v589_v2 = vrot.slane %v588_v1, 2 }
 0x171   : > { %v590_v3 = vadd.f32 %v589_v2, %v588_v1 }
 0x173   : > { %v591_v4 = vrot.slane %v590_v3, 1 }
 0x175   : > { %v592_v5 = vadd.f32 %v591_v4, %v590_v3 }
 0x177   : > { %805 = vpush %v592_v5 }
 0x1a8   : > { %s806_s30 = spop %805 }
 0x1a9   : > { %v594_v6 = vstv %s806_s30 }
 0x1aa   : > { %596 = vst.msk [vmem:[%s336_s24] sm:$0x1] %vm595_vm2, %v594_v6 }
 0x1ab PF: > { %s23_s20 = sadd.s32 1, %s1061_s20   ;;  %s1349_s15 = smov %s1045_s16 }
 0x1ac   : > { %p20_p0 = scmp.ge.s32.totalorder %s23_s20, 4   ;;  %s1350_s16 = smov %s1049_s17 }
 0x1ad   : > { %s1351_s17 = smov %s1137_s26  ;;  %s1352_s18 = smov %s1057_s19 }
 0x1ae   : > { %s1353_s19 = smov %s1355_s22  ;;  %22 = sbr.rel (!%p20_p0) target bundleno = 8 (0x8), region = 121 }
 0x1b3   :  { %614 = vsyncpa [#allocation4], 1 }
 0x1b4   :  { %616 = vsyncpa [#allocation4 + $0x1], 1 }
 0x1b5   :  { %617 = vsyncpa [#allocation6], 1 }
 0x1b6   :  { %619 = vsyncpa [#allocation6 + $0x1], 1 }
 0x1b7   :  { %620 = vsyncpa [#allocation9], 1 }
 0x1b8   :  { %622 = vsyncpa [#allocation9 + $0x1], 1 }

</bundles_post_ra>
